<compile_context>
chip_gen: v6e
topology: v6e:2x2x1
jax: 0.10.0
libtpu: 0.0.40
codegen_flags: <defaults>
</compile_context>

<pallas_src>
import functools

import jax
import jax.numpy as jnp
from jax.experimental import pallas as pl
from jax.experimental.pallas import tpu as pltpu

LANE = 128
MIB = 1024 * 1024


def _round_up(x, m):
    return (x + m - 1) // m * m


def _pick_tile_m(n_pad):
    """Row tile for Â blocks: divides n_pad, >=2 tiles when possible, and keeps
    one bf16 Â block at <= ~4 MiB (large DMAs without blowing v7x VMEM)."""
    candidates = [t for t in (512, 256, 128) if n_pad % t == 0]
    multi = [t for t in candidates if n_pad // t >= 2]
    if multi:
        candidates = multi
    for t in candidates:                      # descending
        if t * n_pad * 2 <= 4 * MIB:
            return t
    return candidates[-1]                     # 128 always divides n_pad


def _vmem_limit(*buffer_bytes):
    est = sum(buffer_bytes)
    # 2x margin, floor at the default scoped limit, cap at v7x physical VMEM.
    return int(min(max(2 * est, 32 * MIB), 64 * MIB))


def _a_hat_spec(tile_m, n_pad):
    """Â row-block spec; triple-buffer the streamed blocks when cheap."""
    block_bytes = tile_m * n_pad * 2
    steps = n_pad // tile_m
    if hasattr(pl, "Buffered") and steps >= 3 and block_bytes <= 2 * MIB:
        try:
            return pl.BlockSpec((tile_m, n_pad), lambda i: (i, 0),
                                pipeline_mode=pl.Buffered(3))
        except TypeError:
            pass
    return pl.BlockSpec((tile_m, n_pad), lambda i: (i, 0))


# ----------------------------------------------------------------------------
# Small row-tiled projection kernel:  out = X @ W   (W resident in VMEM)
# ----------------------------------------------------------------------------
def _proj_kernel(x_ref, w_ref, o_ref):
    o_ref[...] = jnp.dot(x_ref[...], w_ref[...],
                         preferred_element_type=jnp.float32).astype(o_ref.dtype)


def project(x_bf, w_bf, *, tile_m):
    """[n_pad, f_pad] bf16 @ [f_pad, h_pad] bf16 -> [n_pad, h_pad] bf16."""
    n_pad, f_pad = x_bf.shape
    h_pad = w_bf.shape[1]
    vmem = _vmem_limit(2 * tile_m * f_pad * 2, f_pad * h_pad * 2,
                       2 * tile_m * h_pad * 2)
    cost = pl.CostEstimate(
        flops=2 * n_pad * f_pad * h_pad, transcendentals=0,
        bytes_accessed=2 * n_pad * f_pad + 2 * f_pad * h_pad + 2 * n_pad * h_pad)
    return pl.pallas_call(
        _proj_kernel,
        out_shape=jax.ShapeDtypeStruct((n_pad, h_pad), jnp.bfloat16),
        grid=(n_pad // tile_m,),
        in_specs=[pl.BlockSpec((tile_m, f_pad), lambda i: (i, 0)),
                  pl.BlockSpec((f_pad, h_pad), lambda i: (0, 0))],   # resident
        out_specs=pl.BlockSpec((tile_m, h_pad), lambda i: (i, 0)),
        compiler_params=pltpu.CompilerParams(
            dimension_semantics=("parallel",), vmem_limit_bytes=vmem),
        cost_estimate=cost,
    )(x_bf, w_bf)


# ----------------------------------------------------------------------------
# Aggregation kernels:  out = [ReLU](Â_rows @ XW + b) [@ W_next]
# Â is streamed in (tile_m, n_pad) row blocks; XW / b / W_next are resident.
# ----------------------------------------------------------------------------
def _agg_kernel(a_ref, xw_ref, b_ref, o_ref, *, relu):
    h = jnp.dot(a_ref[...], xw_ref[...],
                preferred_element_type=jnp.float32) + b_ref[...]
    if relu:
        h = jnp.maximum(h, 0.0)
    o_ref[...] = h.astype(o_ref.dtype)


def _agg_proj_kernel(a_ref, xw_ref, b_ref, wn_ref, o_ref, *, relu):
    h = jnp.dot(a_ref[...], xw_ref[...],
                preferred_element_type=jnp.float32) + b_ref[...]
    if relu:
        h = jnp.maximum(h, 0.0)
    # Fused epilogue: project the activated row tile with the NEXT layer's
    # weights (bf16 on the MXU), so the next aggregation needs no weight matmul.
    o_ref[...] = jnp.dot(h.astype(jnp.bfloat16), wn_ref[...],
                         preferred_element_type=jnp.float32).astype(o_ref.dtype)


def gcn_aggregate(a_p, xw, b, *, w_next=None, relu, out_dtype, tile_m):
    """a_p: [n_pad, n_pad] bf16, xw: [n_pad, h_in] bf16, b: [1, h_in] f32,
    optional w_next: [h_in, h_out] bf16."""
    n_pad = a_p.shape[0]
    h_in = xw.shape[1]
    out_isz = jnp.dtype(out_dtype).itemsize
    a_block_bytes = tile_m * n_pad * 2

    in_specs = [_a_hat_spec(tile_m, n_pad),
                pl.BlockSpec((n_pad, h_in), lambda i: (0, 0)),   # XW resident
                pl.BlockSpec(b.shape, lambda i: (0, 0))]         # bias resident
    args = [a_p, xw, b]
    flops = 2 * n_pad * n_pad * h_in
    bytes_acc = 2 * n_pad * n_pad + 2 * n_pad * h_in + 4 * b.size
    if w_next is None:
        h_out = h_in
        wn_bytes = 0
        kernel = functools.partial(_agg_kernel, relu=relu)
    else:
        h_out = w_next.shape[1]
        wn_bytes = 2 * h_in * h_out
        kernel = functools.partial(_agg_proj_kernel, relu=relu)
        in_specs.append(pl.BlockSpec(w_next.shape, lambda i: (0, 0)))
        args.append(w_next)
        flops += 2 * n_pad * h_in * h_out
        bytes_acc += wn_bytes
    bytes_acc += n_pad * h_out * out_isz

    vmem = _vmem_limit(3 * a_block_bytes,          # streamed Â (<= 3 buffers)
                       n_pad * h_in * 2,           # resident XW
                       wn_bytes,                   # resident W_next
                       2 * tile_m * h_out * out_isz)

    return pl.pallas_call(
        kernel,
        out_shape=jax.ShapeDtypeStruct((n_pad, h_out), out_dtype),
        grid=(n_pad // tile_m,),
        in_specs=in_specs,
        out_specs=pl.BlockSpec((tile_m, h_out), lambda i: (i, 0)),
        compiler_params=pltpu.CompilerParams(
            dimension_semantics=("parallel",), vmem_limit_bytes=vmem),
        cost_estimate=pl.CostEstimate(flops=flops, transcendentals=0,
                                      bytes_accessed=bytes_acc),
    )(*args)


# ----------------------------------------------------------------------------
# GCN-normalized dense adjacency Â = D^{-1/2}(A ∪ I)D^{-1/2} (self-loop dedup).
# ----------------------------------------------------------------------------
def normalized_adjacency(edge_index, num_nodes):
    src, dst = edge_index[0], edge_index[1]
    adj = jnp.zeros((num_nodes, num_nodes), jnp.float32)
    adj = adj.at[src, dst].set(1.0)
    adj = jnp.maximum(adj, adj.T)                                  # undirected
    adj = jnp.maximum(adj, jnp.eye(num_nodes, dtype=jnp.float32))  # A ∪ I
    deg = adj.sum(axis=1)
    d_inv_sqrt = jnp.where(deg > 0, jax.lax.rsqrt(deg), 0.0)
    return adj * d_inv_sqrt[:, None] * d_inv_sqrt[None, :]


# ----------------------------------------------------------------------------
# Forward pass of Discriminator (use_ub=False): just the encoder.
# ----------------------------------------------------------------------------
@jax.jit
def discriminator_forward(x, edge_index, w1, b1, w2, b2):
    """x: [N, F_in] f32, edge_index: [2, E] int32."""
    n, f_in = x.shape
    h1_dim = w1.shape[1]
    h2_dim = w2.shape[1]

    n_pad = _round_up(n, LANE)
    f_pad = _round_up(f_in, LANE)
    h1_pad = _round_up(h1_dim, LANE)
    h2_pad = _round_up(h2_dim, LANE)
    tile_m = _pick_tile_m(n_pad)

    # Â built directly in padded bf16; under one jit the construction, cast and
    # pad fuse into a single pass (no separate wrapper pass over Â).
    a_hat = normalized_adjacency(edge_index, n)
    a_p = jnp.zeros((n_pad, n_pad), jnp.bfloat16).at[:n, :n].set(
        a_hat.astype(jnp.bfloat16))

    # Zero padding is exact for the sliced output: padded Â rows/cols and
    # padded W/b columns are zero.  (Padded node rows of intermediates hold
    # bias junk — harmless, since Â's padded columns zero them out and the
    # final slice drops padded rows.)
    x_p = jnp.pad(x.astype(jnp.bfloat16), ((0, n_pad - n), (0, f_pad - f_in)))
    w1_p = jnp.pad(w1.astype(jnp.bfloat16),
                   ((0, f_pad - f_in), (0, h1_pad - h1_dim)))
    b1_p = jnp.pad(b1.astype(jnp.float32), ((0, 0), (0, h1_pad - h1_dim)))
    w2_p = jnp.pad(w2.astype(jnp.bfloat16),
                   ((0, h1_pad - h1_dim), (0, h2_pad - h2_dim)))
    b2_p = jnp.pad(b2.astype(jnp.float32), ((0, 0), (0, h2_pad - h2_dim)))

    # Pre-projection: XW1 = X @ W1.
    xw1 = project(x_p, w1_p, tile_m=tile_m)
    # Layer 1 aggregation + fused W2 projection: XW2 = ReLU(Â@XW1 + b1) @ W2.
    xw2 = gcn_aggregate(a_p, xw1, b1_p, w_next=w2_p, relu=True,
                        out_dtype=jnp.bfloat16, tile_m=tile_m)
    # Layer 2 aggregation: Z = Â @ XW2 + b2.
    z = gcn_aggregate(a_p, xw2, b2_p, w_next=None, relu=False,
                      out_dtype=jnp.float32, tile_m=tile_m)
    return z[:n, :h2_dim]


def reference_forward(x, a_hat, w1, b1, w2, b2):
    h1 = jnp.maximum(a_hat @ (x @ w1) + b1, 0.0)
    return a_hat @ (h1 @ w2) + b2


if __name__ == "__main__":
    # Small graph, but N > 128 so the row-tiled grid runs multiple tiles.
    N, F_IN, NUM_HIDDEN = 200, 16, 32
    E = 600

    key = jax.random.PRNGKey(0)
    kx, ke, k1, k2, k3, k4 = jax.random.split(key, 6)

    x = jax.random.normal(kx, (N, F_IN), dtype=jnp.float32)
    edge_index = jax.random.randint(ke, (2, E), 0, N, dtype=jnp.int32)

    w1 = jax.random.normal(k1, (F_IN, NUM_HIDDEN), jnp.float32) / jnp.sqrt(F_IN)
    b1 = 0.01 * jax.random.normal(k2, (1, NUM_HIDDEN), jnp.float32)
    w2 = jax.random.normal(k3, (NUM_HIDDEN, NUM_HIDDEN), jnp.float32) / jnp.sqrt(NUM_HIDDEN)
    b2 = 0.01 * jax.random.normal(k4, (1, NUM_HIDDEN), jnp.float32)

    z = discriminator_forward(x, edge_index, w1, b1, w2, b2)
    z = jax.block_until_ready(z)

    a_hat = normalized_adjacency(edge_index, N)
    z_ref = reference_forward(x, a_hat, w1, b1, w2, b2)
    assert z.shape == (N, NUM_HIDDEN)
    # bf16 matmul inputs -> compare against the f32 reference with a loose tol.
    assert jnp.allclose(z, z_ref, atol=5e-2, rtol=5e-2), (
        "mismatch vs reference: max abs err = "
        f"{float(jnp.max(jnp.abs(z - z_ref)))}")

    print("KERNEL_OK")
</pallas_src>

<mosaic_0001>
module attributes {stable_mosaic.version = 11 : i64} {
  func.func @_proj_kernel(%arg0: i32, %arg1: memref<128x128xbf16, #tpu.memory_space<vmem>>, %arg2: memref<128x128xbf16, #tpu.memory_space<vmem>>, %arg3: memref<128x128xbf16, #tpu.memory_space<vmem>>) attributes {dimension_semantics = [#tpu.dimension_semantics<parallel>], iteration_bounds = array<i64: 2>, scalar_prefetch = 0 : i64, scratch_operands = 0 : i64, tpu.core_type = #tpu.core_type<tc>, window_params = [{transform_indices = @transform_0, window_bounds = array<i64: 128, 128>}, {pipeline_mode = #tpu.pipeline_mode<synchronous>, transform_indices = @transform_1, window_bounds = array<i64: 128, 128>}, {transform_indices = @transform_2, window_bounds = array<i64: 128, 128>}]} {
    %c0 = arith.constant 0 : index
    %c0_0 = arith.constant 0 : index
    %0 = vector.load %arg1[%c0, %c0_0] : memref<128x128xbf16, #tpu.memory_space<vmem>>, vector<128x128xbf16>
    %c0_1 = arith.constant 0 : index
    %c0_2 = arith.constant 0 : index
    %1 = vector.load %arg2[%c0_1, %c0_2] : memref<128x128xbf16, #tpu.memory_space<vmem>>, vector<128x128xbf16>
    %cst = arith.constant dense<0.000000e+00> : vector<128x128xf32>
    %2 = tpu.matmul %0, %1, %cst {dimension_numbers = #tpu.dot_dimension_numbers<[1], [0], [0], [1], [0, 0, 1, 1], [], []>} : vector<128x128xbf16>, vector<128x128xbf16>, vector<128x128xf32> -> vector<128x128xf32>
    %3 = arith.truncf %2 : vector<128x128xf32> to vector<128x128xbf16>
    %c0_3 = arith.constant 0 : index
    %c0_4 = arith.constant 0 : index
    %4 = vector.load %arg3[%c0_3, %c0_4] : memref<128x128xbf16, #tpu.memory_space<vmem>>, vector<128x128xbf16>
    tpu.vector_store %arg3[%c0_3, %c0_4], %3 {strides = array<i32>} : memref<128x128xbf16, #tpu.memory_space<vmem>>, vector<128x128xbf16>,
    return
  }
  func.func @transform_0(%arg0: i32) -> (i32, i32) {
    %c0_i32 = arith.constant 0 : i32
    %c0_i32_0 = arith.constant 0 : i32
    return %arg0, %c0_i32 : i32, i32
  }
  func.func @transform_1(%arg0: i32) -> (i32, i32) {
    %c0_i32 = arith.constant 0 : i32
    %c0_i32_0 = arith.constant 0 : i32
    %c0_i32_1 = arith.constant 0 : i32
    return %c0_i32, %c0_i32_0 : i32, i32
  }
  func.func @transform_2(%arg0: i32) -> (i32, i32) {
    %c0_i32 = arith.constant 0 : i32
    %c0_i32_0 = arith.constant 0 : i32
    return %arg0, %c0_i32 : i32, i32
  }
}

module attributes {stable_mosaic.version = 11 : i64} {
  func.func @_agg_kernel(%arg0: i32, %arg1: memref<128x256xbf16, #tpu.memory_space<vmem>>, %arg2: memref<256x128xbf16, #tpu.memory_space<vmem>>, %arg3: memref<1x128xf32, #tpu.memory_space<vmem>>, %arg4: memref<128x128xf32, #tpu.memory_space<vmem>>) attributes {dimension_semantics = [#tpu.dimension_semantics<parallel>], iteration_bounds = array<i64: 2>, scalar_prefetch = 0 : i64, scratch_operands = 0 : i64, tpu.core_type = #tpu.core_type<tc>, window_params = [{transform_indices = @transform_0, window_bounds = array<i64: 128, 256>}, {pipeline_mode = #tpu.pipeline_mode<synchronous>, transform_indices = @transform_1, window_bounds = array<i64: 256, 128>}, {pipeline_mode = #tpu.pipeline_mode<synchronous>, transform_indices = @transform_2, window_bounds = array<i64: 1, 128>}, {transform_indices = @transform_3, window_bounds = array<i64: 128, 128>}]} {
    %c0 = arith.constant 0 : index
    %c0_0 = arith.constant 0 : index
    %0 = vector.load %arg1[%c0, %c0_0] : memref<128x256xbf16, #tpu.memory_space<vmem>>, vector<128x256xbf16>
    %c0_1 = arith.constant 0 : index
    %c0_2 = arith.constant 0 : index
    %1 = vector.load %arg2[%c0_1, %c0_2] : memref<256x128xbf16, #tpu.memory_space<vmem>>, vector<256x128xbf16>
    %cst = arith.constant dense<0.000000e+00> : vector<128x128xf32>
    %2 = tpu.matmul %0, %1, %cst {dimension_numbers = #tpu.dot_dimension_numbers<[1], [0], [0], [1], [0, 0, 1, 1], [], []>} : vector<128x256xbf16>, vector<256x128xbf16>, vector<128x128xf32> -> vector<128x128xf32>
    %c0_3 = arith.constant 0 : index
    %c0_4 = arith.constant 0 : index
    %3 = vector.load %arg3[%c0_3, %c0_4] : memref<1x128xf32, #tpu.memory_space<vmem>>, vector<1x128xf32>
    %4 = vector.broadcast %3 : vector<1x128xf32> to vector<128x128xf32>
    %5 = arith.addf %2, %4 : vector<128x128xf32>
    %c0_5 = arith.constant 0 : index
    %c0_6 = arith.constant 0 : index
    %6 = vector.load %arg4[%c0_5, %c0_6] : memref<128x128xf32, #tpu.memory_space<vmem>>, vector<128x128xf32>
    tpu.vector_store %arg4[%c0_5, %c0_6], %5 {strides = array<i32>} : memref<128x128xf32, #tpu.memory_space<vmem>>, vector<128x128xf32>,
    return
  }
  func.func @transform_0(%arg0: i32) -> (i32, i32) {
    %c0_i32 = arith.constant 0 : i32
    %c0_i32_0 = arith.constant 0 : i32
    return %arg0, %c0_i32 : i32, i32
  }
  func.func @transform_1(%arg0: i32) -> (i32, i32) {
    %c0_i32 = arith.constant 0 : i32
    %c0_i32_0 = arith.constant 0 : i32
    %c0_i32_1 = arith.constant 0 : i32
    return %c0_i32, %c0_i32_0 : i32, i32
  }
  func.func @transform_2(%arg0: i32) -> (i32, i32) {
    %c0_i32 = arith.constant 0 : i32
    %c0_i32_0 = arith.constant 0 : i32
    %c0_i32_1 = arith.constant 0 : i32
    return %c0_i32, %c0_i32_0 : i32, i32
  }
  func.func @transform_3(%arg0: i32) -> (i32, i32) {
    %c0_i32 = arith.constant 0 : i32
    %c0_i32_0 = arith.constant 0 : i32
    return %arg0, %c0_i32 : i32, i32
  }
}

module attributes {stable_mosaic.version = 11 : i64} {
  func.func @_agg_proj_kernel(%arg0: i32, %arg1: memref<128x256xbf16, #tpu.memory_space<vmem>>, %arg2: memref<256x128xbf16, #tpu.memory_space<vmem>>, %arg3: memref<1x128xf32, #tpu.memory_space<vmem>>, %arg4: memref<128x128xbf16, #tpu.memory_space<vmem>>, %arg5: memref<128x128xbf16, #tpu.memory_space<vmem>>) attributes {dimension_semantics = [#tpu.dimension_semantics<parallel>], iteration_bounds = array<i64: 2>, scalar_prefetch = 0 : i64, scratch_operands = 0 : i64, tpu.core_type = #tpu.core_type<tc>, window_params = [{transform_indices = @transform_0, window_bounds = array<i64: 128, 256>}, {pipeline_mode = #tpu.pipeline_mode<synchronous>, transform_indices = @transform_1, window_bounds = array<i64: 256, 128>}, {pipeline_mode = #tpu.pipeline_mode<synchronous>, transform_indices = @transform_2, window_bounds = array<i64: 1, 128>}, {pipeline_mode = #tpu.pipeline_mode<synchronous>, transform_indices = @transform_3, window_bounds = array<i64: 128, 128>}, {transform_indices = @transform_4, window_bounds = array<i64: 128, 128>}]} {
    %c0 = arith.constant 0 : index
    %c0_0 = arith.constant 0 : index
    %0 = vector.load %arg1[%c0, %c0_0] : memref<128x256xbf16, #tpu.memory_space<vmem>>, vector<128x256xbf16>
    %c0_1 = arith.constant 0 : index
    %c0_2 = arith.constant 0 : index
    %1 = vector.load %arg2[%c0_1, %c0_2] : memref<256x128xbf16, #tpu.memory_space<vmem>>, vector<256x128xbf16>
    %cst = arith.constant dense<0.000000e+00> : vector<128x128xf32>
    %2 = tpu.matmul %0, %1, %cst {dimension_numbers = #tpu.dot_dimension_numbers<[1], [0], [0], [1], [0, 0, 1, 1], [], []>} : vector<128x256xbf16>, vector<256x128xbf16>, vector<128x128xf32> -> vector<128x128xf32>
    %c0_3 = arith.constant 0 : index
    %c0_4 = arith.constant 0 : index
    %3 = vector.load %arg3[%c0_3, %c0_4] : memref<1x128xf32, #tpu.memory_space<vmem>>, vector<1x128xf32>
    %4 = vector.broadcast %3 : vector<1x128xf32> to vector<128x128xf32>
    %5 = arith.addf %2, %4 : vector<128x128xf32>
    %cst_5 = arith.constant 0.000000e+00 : f32
    %6 = vector.broadcast %cst_5 : f32 to vector<128x128xf32>
    %7 = arith.maximumf %5, %6 : vector<128x128xf32>
    %8 = arith.truncf %7 : vector<128x128xf32> to vector<128x128xbf16>
    %c0_6 = arith.constant 0 : index
    %c0_7 = arith.constant 0 : index
    %9 = vector.load %arg4[%c0_6, %c0_7] : memref<128x128xbf16, #tpu.memory_space<vmem>>, vector<128x128xbf16>
    %cst_8 = arith.constant dense<0.000000e+00> : vector<128x128xf32>
    %10 = tpu.matmul %8, %9, %cst_8 {dimension_numbers = #tpu.dot_dimension_numbers<[1], [0], [0], [1], [0, 0, 1, 1], [], []>} : vector<128x128xbf16>, vector<128x128xbf16>, vector<128x128xf32> -> vector<128x128xf32>
    %11 = arith.truncf %10 : vector<128x128xf32> to vector<128x128xbf16>
    %c0_9 = arith.constant 0 : index
    %c0_10 = arith.constant 0 : index
    %12 = vector.load %arg5[%c0_9, %c0_10] : memref<128x128xbf16, #tpu.memory_space<vmem>>, vector<128x128xbf16>
    tpu.vector_store %arg5[%c0_9, %c0_10], %11 {strides = array<i32>} : memref<128x128xbf16, #tpu.memory_space<vmem>>, vector<128x128xbf16>,
    return
  }
  func.func @transform_0(%arg0: i32) -> (i32, i32) {
    %c0_i32 = arith.constant 0 : i32
    %c0_i32_0 = arith.constant 0 : i32
    return %arg0, %c0_i32 : i32, i32
  }
  func.func @transform_1(%arg0: i32) -> (i32, i32) {
    %c0_i32 = arith.constant 0 : i32
    %c0_i32_0 = arith.constant 0 : i32
    %c0_i32_1 = arith.constant 0 : i32
    return %c0_i32, %c0_i32_0 : i32, i32
  }
  func.func @transform_2(%arg0: i32) -> (i32, i32) {
    %c0_i32 = arith.constant 0 : i32
    %c0_i32_0 = arith.constant 0 : i32
    %c0_i32_1 = arith.constant 0 : i32
    return %c0_i32, %c0_i32_0 : i32, i32
  }
  func.func @transform_3(%arg0: i32) -> (i32, i32) {
    %c0_i32 = arith.constant 0 : i32
    %c0_i32_0 = arith.constant 0 : i32
    %c0_i32_1 = arith.constant 0 : i32
    return %c0_i32, %c0_i32_0 : i32, i32
  }
  func.func @transform_4(%arg0: i32) -> (i32, i32) {
    %c0_i32 = arith.constant 0 : i32
    %c0_i32_0 = arith.constant 0 : i32
    return %arg0, %c0_i32 : i32, i32
  }
}

</mosaic_0001>

<bundles_post_ra>
// kernel: discriminator_forward.5
= control target key start
LH: loop header
LB: loop body
LE: loop exit
PB: predicated region body
PF: predicated region fallthrough
CT: control target
= control target key end

     0   :  { %s780_s12 = smov 0   ;;  %s909_s0 = inlined_call_operand.vmem [shape: bf16[256,256], index: 0, kind: input, shape index: {}]   ;;  %s910_s1 = inlined_call_operand.vmem [shape: bf16[256,128], index: 1, kind: input, shape index: {}]   ;;  %s911_s2 = inlined_call_operand.vmem [shape: f32[1,128], index: 2, kind: input, shape index: {}]   ;;  %s912_s3 = inlined_call_operand.vmem [shape: f32[256,128], index: 3, kind: output, shape index: {}]  }
   0x1 LB: > { %s578_s13 = sadd.s32 4294967295, %s758_s12   ;;  %p582_p0 = scmp.ge.s32.totalorder %s758_s12, 1  ;;  %s758_s12 = sphi %s780_s12, %s13_s12  }
   0x2   : > { %p139_p1 = scmp.lt.s32.totalorder %s758_s12, 3 }
   0x4   : > { %p140_p2 = pnand %p582_p0, %p139_p1 }
   0x5   : > { %s583_s16 = sshll.u32 (!%p140_p2), %s578_s13, 4 }
   0x6   : > { %143 = sbr.rel (%p140_p2) target bundleno = 272 (0x110), region = 32  ;;  %p165_p3 = scmp.lt.s32.totalorder (!%p140_p2), %s583_s16, 31 }
   0xb   : > { %v712_v0 = vld [vmem:[%s910_s1 + $0x78] sm:$0xff]   ;;  %v714_v2 = vld [vmem:[%s910_s1 + $0x70] sm:$0xff]   ;;  %v716_v4 = vld [vmem:[%s910_s1 + $0x68] sm:$0xff]   ;;  %s914_s16 = smov (!%p165_p3, %s583_s16), 31 }
   0xc   : > { %v713_v1 = vld [vmem:[%s910_s1 + $0x38] sm:$0xff]   ;;  %624 = vmatprep.subr.bf16.mxu0 %v712_v0  ;;  %688 = vmatprep.subr.bf16.mxu1 %v712_v0  ;;  %v715_v3 = vld [vmem:[%s910_s1 + $0x30] sm:$0xff]   ;;  %v717_v5 = vld [vmem:[%s910_s1 + $0x28] sm:$0xff]   ;;  %s623_s4 = sshll.u32 %s914_s16, 3 }
   0xd   : > { %625 = vmatpush3.bf16.msra.mxu0 %v713_v1  ;;  %696 = vmatpush3.bf16.msra.mxu1 %v713_v1  ;;  %v718_v6 = vld [vmem:[%s910_s1 + $0x60] sm:$0xff]   ;;  %v720_v8 = vld [vmem:[%s910_s1 + $0x58] sm:$0xff]   ;;  %s823_s9 = scalar_lea.vmem %s909_s0, %s623_s4  ;;  %v722_v10 = vld [vmem:[%s910_s1 + $0x50] sm:$0xff]   ;;  %s872_s30 = scalar_lea.vmem %s912_s3, %s623_s4 }
   0xe   : > { %626 = vmatprep.subr.bf16.mxu0 %v714_v2  ;;  %689 = vmatprep.subr.bf16.mxu1 %v714_v2  ;;  %v719_v7 = vld [vmem:[%s910_s1 + $0x20] sm:$0xff]   ;;  %v721_v9 = vld [vmem:[%s910_s1 + $0x18] sm:$0xff]   ;;  %v723_v13 = vld [vmem:[%s910_s1 + $0x10] sm:$0xff]  }
   0xf   : > { %v730_v11 = vld [vmem:[%s823_s9 + $0x4] ss:$8 sps:$4 sm:$0xff]   ;;  %v728_v18 = vld [vmem:[%s823_s9] ss:$8 sps:$4 sm:$0xff]   ;;  %v734_v20 = vld [vmem:[%s823_s9 + $0x14] ss:$8 sps:$4 sm:$0xff]  }
  0x10   : > { %v733_v12 = vld [vmem:[%s823_s9 + $0x44] ss:$8 sps:$4 sm:$0xff]   ;;  %441 = vmatprep.mubr.bf16.mxu0 %v730_v11  ;;  %v731_v19 = vld [vmem:[%s823_s9 + $0x40] ss:$8 sps:$4 sm:$0xff]   ;;  %v736_v21 = vld [vmem:[%s823_s9 + $0x54] ss:$8 sps:$4 sm:$0xff]  }
  0x11   : > { %627 = vmatpush3.bf16.msra.mxu0 %v715_v3  ;;  %697 = vmatpush3.bf16.msra.mxu1 %v715_v3  ;;  %v724_v14 = vld [vmem:[%s910_s1 + $0x48] sm:$0xff]   ;;  %v726_v16 = vld [vmem:[%s910_s1 + $0x40] sm:$0xff]   ;;  %v738_v22 = vld [vmem:[%s823_s9 + $0x10] ss:$8 sps:$4 sm:$0xff]  }
  0x12   : > { %628 = vmatprep.subr.bf16.mxu0 %v716_v4  ;;  %690 = vmatprep.subr.bf16.mxu1 %v716_v4  ;;  %v725_v15 = vld [vmem:[%s910_s1 + $0x8] sm:$0xff]   ;;  %v727_v17 = vld [vmem:[%s910_s1] sm:$0xff]   ;;  %v739_v23 = vld [vmem:[%s823_s9 + $0x50] ss:$8 sps:$4 sm:$0xff]  }
  0x13   : > { %473 = vmatprep.mubr.bf16.mxu1 %v733_v12  ;;  %v740_v24 = vld [vmem:[%s823_s9 + $0x24] ss:$8 sps:$4 sm:$0xff]   ;;  %v744_v26 = vld [vmem:[%s823_s9 + $0x20] ss:$8 sps:$4 sm:$0xff]   ;;  %v746_v28 = vld [vmem:[%s823_s9 + $0x34] ss:$8 sps:$4 sm:$0xff]  }
  0x14   : > { %v742_v25 = vld [vmem:[%s823_s9 + $0x64] ss:$8 sps:$4 sm:$0xff]   ;;  %v745_v27 = vld [vmem:[%s823_s9 + $0x60] ss:$8 sps:$4 sm:$0xff]   ;;  %v748_v29 = vld [vmem:[%s823_s9 + $0x74] ss:$8 sps:$4 sm:$0xff]  }
  0x15   : > { %629 = vmatpush3.bf16.msra.mxu0 %v717_v5  ;;  %698 = vmatpush3.bf16.msra.mxu1 %v717_v5  ;;  %v750_v30 = vld [vmem:[%s823_s9 + $0x30] ss:$8 sps:$4 sm:$0xff]   ;;  %v865_v34 = vld [vmem:[%s911_s2] ss:$0 sm:$0xff] }
  0x16   : > { %630 = vmatprep.subr.bf16.mxu0 %v718_v6  ;;  %691 = vmatprep.subr.bf16.mxu1 %v718_v6  ;;  %v751_v31 = vld [vmem:[%s823_s9 + $0x70] ss:$8 sps:$4 sm:$0xff]  }
  0x19   : > { %631 = vmatpush3.bf16.msra.mxu0 %v719_v7  ;;  %699 = vmatpush3.bf16.msra.mxu1 %v719_v7 }
  0x1a   : > { %632 = vmatprep.subr.bf16.mxu0 %v720_v8  ;;  %692 = vmatprep.subr.bf16.mxu1 %v720_v8 }
  0x1d   : > { %633 = vmatpush3.bf16.msra.mxu0 %v721_v9  ;;  %700 = vmatpush3.bf16.msra.mxu1 %v721_v9 }
  0x1e   : > { %634 = vmatprep.subr.bf16.mxu0 %v722_v10  ;;  %693 = vmatprep.subr.bf16.mxu1 %v722_v10 }
  0x21   : > { %635 = vmatpush3.bf16.msra.mxu0 %v723_v13  ;;  %701 = vmatpush3.bf16.msra.mxu1 %v723_v13 }
  0x22   : > { %636 = vmatprep.subr.bf16.mxu0 %v724_v14  ;;  %694 = vmatprep.subr.bf16.mxu1 %v724_v14 }
  0x25   : > { %637 = vmatpush3.bf16.msra.mxu0 %v725_v15  ;;  %702 = vmatpush3.bf16.msra.mxu1 %v725_v15 }
  0x26   : > { %638 = vmatprep.subr.bf16.mxu0 %v726_v16  ;;  %695 = vmatprep.subr.bf16.mxu1 %v726_v16 }
  0x29   : > { %639 = vmatpush3.bf16.msra.mxu0 %v727_v17  ;;  %703 = vmatpush3.bf16.msra.mxu1 %v727_v17 }
  0x2c   : > { %442 = vmatmul.mubr.bf16.vlgmr.msra.gmra.mxu0 %v728_v18  ;;  %474 = vmatmul.mubr.bf16.vlgmr.msra.gmra.mxu1 %v731_v19 }
  0x2d   : > { %449 = vmatprep.mubr.bf16.mxu0 %v734_v20  ;;  %481 = vmatprep.mubr.bf16.mxu1 %v736_v21 }
  0x34   : > { %450 = vmatmul.mubr.bf16.gmra.mxu0 %v738_v22  ;;  %482 = vmatmul.mubr.bf16.gmra.mxu1 %v739_v23 }
  0x35   : > { %457 = vmatprep.mubr.bf16.mxu0 %v740_v24  ;;  %489 = vmatprep.mubr.bf16.mxu1 %v742_v25 }
  0x3c   : > { %458 = vmatmul.mubr.bf16.gmra.mxu0 %v744_v26  ;;  %490 = vmatmul.mubr.bf16.gmra.mxu1 %v745_v27 }
  0x3d   : > { %465 = vmatprep.mubr.bf16.mxu0 %v746_v28  ;;  %497 = vmatprep.mubr.bf16.mxu1 %v748_v29 }
  0x44   : > { %466 = vmatmul.mubr.bf16.gmra.mxu0 %v750_v30  ;;  %498 = vmatmul.mubr.bf16.gmra.mxu1 %v751_v31 }
  0xec   : > { %v640_v32 = vpop.f32.mrf.mxu0  ;;  %v664_v33 = vpop.f32.mrf.mxu1 }
  0xee   : > { %v641_v35 = vpop.f32.mrf.mxu0  ;;  %v665_v36 = vpop.f32.mrf.mxu1 }
  0xef   : > { %v642_v37 = vadd.f32 %v641_v35, %v640_v32  ;;  %v666_v38 = vadd.f32 %v665_v36, %v664_v33 }
  0xf0   : > { %v643_v39 = vpop.f32.mrf.mxu0  ;;  %v667_v40 = vpop.f32.mrf.mxu1 }
  0xf1   : > { %v444_v41 = vadd.f32 %v642_v37, %v865_v34  ;;  %v476_v42 = vadd.f32 %v666_v38, %v865_v34 }
  0xf2   : > { %v644_v43 = vpop.f32.mrf.mxu0  ;;  %v668_v44 = vpop.f32.mrf.mxu1 }
  0xf3   : > { %506 = vst [vmem:[%s872_s30] sm:$0xff] %v444_v41  ;;  %514 = vst [vmem:[%s872_s30 + $0x40] sm:$0xff] %v476_v42  ;;  %v645_v45 = vadd.f32 %v644_v43, %v643_v39  ;;  %v669_v46 = vadd.f32 %v668_v44, %v667_v40 }
  0xf4   : > { %v646_v47 = vpop.f32.mrf.mxu0  ;;  %v670_v48 = vpop.f32.mrf.mxu1 }
  0xf5   : > { %v447_v49 = vadd.f32 %v645_v45, %v865_v34  ;;  %v479_v50 = vadd.f32 %v669_v46, %v865_v34 }
  0xf6   : > { %v647_v51 = vpop.f32.mrf.mxu0  ;;  %v671_v52 = vpop.f32.mrf.mxu1 }
  0xf7   : > { %507 = vst [vmem:[%s872_s30 + $0x8] sm:$0xff] %v447_v49  ;;  %515 = vst [vmem:[%s872_s30 + $0x48] sm:$0xff] %v479_v50  ;;  %v648_v53 = vadd.f32 %v647_v51, %v646_v47  ;;  %v672_v54 = vadd.f32 %v671_v52, %v670_v48 }
  0xf8   : > { %v649_v55 = vpop.f32.mrf.mxu0  ;;  %v673_v56 = vpop.f32.mrf.mxu1 }
  0xf9   : > { %v452_v57 = vadd.f32 %v648_v53, %v865_v34  ;;  %v484_v58 = vadd.f32 %v672_v54, %v865_v34 }
  0xfa   : > { %v650_v59 = vpop.f32.mrf.mxu0  ;;  %v674_v60 = vpop.f32.mrf.mxu1 }
  0xfb   : > { %508 = vst [vmem:[%s872_s30 + $0x10] sm:$0xff] %v452_v57  ;;  %516 = vst [vmem:[%s872_s30 + $0x50] sm:$0xff] %v484_v58  ;;  %v651_v61 = vadd.f32 %v650_v59, %v649_v55  ;;  %v675_v62 = vadd.f32 %v674_v60, %v673_v56 }
  0xfc   : > { %v652_v63 = vpop.f32.mrf.mxu0  ;;  %v676_v0 = vpop.f32.mrf.mxu1 }
  0xfd   : > { %v455_v1 = vadd.f32 %v651_v61, %v865_v34  ;;  %v487_v2 = vadd.f32 %v675_v62, %v865_v34 }
  0xfe   : > { %v653_v3 = vpop.f32.mrf.mxu0  ;;  %v677_v4 = vpop.f32.mrf.mxu1 }
  0xff   : > { %509 = vst [vmem:[%s872_s30 + $0x18] sm:$0xff] %v455_v1  ;;  %517 = vst [vmem:[%s872_s30 + $0x58] sm:$0xff] %v487_v2  ;;  %v654_v5 = vadd.f32 %v653_v3, %v652_v63  ;;  %v678_v6 = vadd.f32 %v677_v4, %v676_v0 }
 0x100   : > { %v655_v7 = vpop.f32.mrf.mxu0  ;;  %v679_v8 = vpop.f32.mrf.mxu1 }
 0x101   : > { %v460_v9 = vadd.f32 %v654_v5, %v865_v34  ;;  %v492_v10 = vadd.f32 %v678_v6, %v865_v34 }
 0x102   : > { %v656_v11 = vpop.f32.mrf.mxu0  ;;  %v680_v12 = vpop.f32.mrf.mxu1 }
 0x103   : > { %510 = vst [vmem:[%s872_s30 + $0x20] sm:$0xff] %v460_v9  ;;  %518 = vst [vmem:[%s872_s30 + $0x60] sm:$0xff] %v492_v10  ;;  %v657_v13 = vadd.f32 %v656_v11, %v655_v7  ;;  %v681_v14 = vadd.f32 %v680_v12, %v679_v8 }
 0x104   : > { %v658_v15 = vpop.f32.mrf.mxu0  ;;  %v682_v16 = vpop.f32.mrf.mxu1 }
 0x105   : > { %v463_v17 = vadd.f32 %v657_v13, %v865_v34  ;;  %v495_v18 = vadd.f32 %v681_v14, %v865_v34 }
 0x106   : > { %v659_v19 = vpop.f32.mrf.mxu0  ;;  %v683_v20 = vpop.f32.mrf.mxu1 }
 0x107   : > { %511 = vst [vmem:[%s872_s30 + $0x28] sm:$0xff] %v463_v17  ;;  %519 = vst [vmem:[%s872_s30 + $0x68] sm:$0xff] %v495_v18  ;;  %v660_v21 = vadd.f32 %v659_v19, %v658_v15  ;;  %v684_v22 = vadd.f32 %v683_v20, %v682_v16 }
 0x108   : > { %v661_v23 = vpop.f32.mrf.mxu0  ;;  %v685_v24 = vpop.f32.mrf.mxu1 }
 0x109   : > { %v468_v25 = vadd.f32 %v660_v21, %v865_v34  ;;  %v500_v26 = vadd.f32 %v684_v22, %v865_v34 }
 0x10a   : > { %v662_v27 = vpop.f32.mrf.mxu0  ;;  %v686_v28 = vpop.f32.mrf.mxu1 }
 0x10b   : > { %512 = vst [vmem:[%s872_s30 + $0x30] sm:$0xff] %v468_v25  ;;  %520 = vst [vmem:[%s872_s30 + $0x70] sm:$0xff] %v500_v26  ;;  %v663_v29 = vadd.f32 %v662_v27, %v661_v23  ;;  %v687_v30 = vadd.f32 %v686_v28, %v685_v24 }
 0x10d   : > { %v471_v31 = vadd.f32 %v663_v29, %v865_v34  ;;  %v503_v32 = vadd.f32 %v687_v30, %v865_v34 }
 0x10f   : > { %513 = vst [vmem:[%s872_s30 + $0x38] sm:$0xff] %v471_v31  ;;  %521 = vst [vmem:[%s872_s30 + $0x78] sm:$0xff] %v503_v32 }
 0x110 PF: > { %s13_s12 = sadd.s32 1, %s758_s12  }
 0x111   : > { %p10_p4 = scmp.ge.s32.totalorder %s13_s12, 4  }
 0x113   :  { %12 = sbr.rel (!%p10_p4) target bundleno = 1 (0x1), region = 62 }

// kernel: discriminator_forward.3
= control target key start
LH: loop header
LB: loop body
LE: loop exit
PB: predicated region body
PF: predicated region fallthrough
CT: control target
= control target key end

     0   :  { %s726_s9 = smov 0   ;;  %s784_s0 = inlined_call_operand.vmem [shape: bf16[256,128], index: 0, kind: input, shape index: {}]   ;;  %s785_s1 = inlined_call_operand.vmem [shape: bf16[128,128], index: 1, kind: input, shape index: {}]   ;;  %s786_s2 = inlined_call_operand.vmem [shape: bf16[256,128], index: 2, kind: output, shape index: {}]  }
   0x1 LB: > { %s509_s10 = sadd.s32 4294967295, %s709_s9   ;;  %p513_p0 = scmp.ge.s32.totalorder %s709_s9, 1  ;;  %s709_s9 = sphi %s726_s9, %s12_s9  }
   0x2   : > { %p113_p1 = scmp.lt.s32.totalorder %s709_s9, 3 }
   0x4   : > { %p114_p2 = pnand %p513_p0, %p113_p1 }
   0x5   : > { %s514_s13 = sshll.u32 (!%p114_p2), %s509_s10, 4 }
   0x6   : > { %117 = sbr.rel (%p114_p2) target bundleno = 254 (0xfe), region = 28  ;;  %p136_p3 = scmp.lt.s32.totalorder (!%p114_p2), %s514_s13, 31 }
   0xb   : > { %v687_v0 = vld [vmem:[%s785_s1 + $0x38] sm:$0xff]   ;;  %v688_v1 = vld [vmem:[%s785_s1 + $0x30] sm:$0xff]   ;;  %s788_s13 = smov (!%p136_p3, %s514_s13), 31  ;;  %v689_v2 = vld [vmem:[%s785_s1 + $0x28] sm:$0xff]  }
   0xc   : > { %631 = vmatprep.subr.bf16.mxu0 %v687_v0  ;;  %663 = vmatprep.subr.bf16.mxu1 %v687_v0  ;;  %s515_s18 = sshll.u32 %s788_s13, 2  ;;  %v690_v3 = vld [vmem:[%s785_s1 + $0x20] sm:$0xff]   ;;  %v691_v6 = vld [vmem:[%s785_s1 + $0x18] sm:$0xff]   ;;  %v692_v7 = vld [vmem:[%s785_s1 + $0x10] sm:$0xff]  }
   0xd   : > { %632 = vmatpush3.bf16.msra.mxu0 %v687_v0  ;;  %671 = vmatpush3.bf16.msra.mxu1 %v687_v0  ;;  %s751_s21 = scalar_lea.vmem %s784_s0, %s515_s18  ;;  %v693_v8 = vld [vmem:[%s785_s1 + $0x8] sm:$0xff]   ;;  %v694_v9 = vld [vmem:[%s785_s1] sm:$0xff]   ;;  %s145_s6 = scalar_lea.vmem %s786_s2, %s515_s18 }
   0xe   : > { %633 = vmatprep.subr.bf16.mxu0 %v688_v1  ;;  %664 = vmatprep.subr.bf16.mxu1 %v688_v1  ;;  %v695_v4 = vld [vmem:[%s751_s21] sm:$0xff]   ;;  %v697_v10 = vld [vmem:[%s751_s21 + $0x8] sm:$0xff]   ;;  %v699_v12 = vld [vmem:[%s751_s21 + $0x10] sm:$0xff]  }
   0xf   : > { %v696_v5 = vld [vmem:[%s751_s21 + $0x20] sm:$0xff]   ;;  %647 = vmatprep.mubr.bf16.mxu0 %v695_v4  ;;  %v698_v11 = vld [vmem:[%s751_s21 + $0x28] sm:$0xff]   ;;  %v700_v13 = vld [vmem:[%s751_s21 + $0x30] sm:$0xff]  }
  0x10   : > { %655 = vmatprep.mubr.bf16.mxu1 %v696_v5  ;;  %v701_v14 = vld [vmem:[%s751_s21 + $0x18] sm:$0xff]  }
  0x11   : > { %634 = vmatpush3.bf16.msra.mxu0 %v688_v1  ;;  %672 = vmatpush3.bf16.msra.mxu1 %v688_v1  ;;  %v702_v15 = vld [vmem:[%s751_s21 + $0x38] sm:$0xff]  }
  0x12   : > { %635 = vmatprep.subr.bf16.mxu0 %v689_v2  ;;  %665 = vmatprep.subr.bf16.mxu1 %v689_v2 }
  0x15   : > { %636 = vmatpush3.bf16.msra.mxu0 %v689_v2  ;;  %673 = vmatpush3.bf16.msra.mxu1 %v689_v2 }
  0x16   : > { %637 = vmatprep.subr.bf16.mxu0 %v690_v3  ;;  %666 = vmatprep.subr.bf16.mxu1 %v690_v3 }
  0x19   : > { %638 = vmatpush3.bf16.msra.mxu0 %v690_v3  ;;  %674 = vmatpush3.bf16.msra.mxu1 %v690_v3 }
  0x1a   : > { %639 = vmatprep.subr.bf16.mxu0 %v691_v6  ;;  %667 = vmatprep.subr.bf16.mxu1 %v691_v6 }
  0x1d   : > { %640 = vmatpush3.bf16.msra.mxu0 %v691_v6  ;;  %675 = vmatpush3.bf16.msra.mxu1 %v691_v6 }
  0x1e   : > { %641 = vmatprep.subr.bf16.mxu0 %v692_v7  ;;  %668 = vmatprep.subr.bf16.mxu1 %v692_v7 }
  0x21   : > { %642 = vmatpush3.bf16.msra.mxu0 %v692_v7  ;;  %676 = vmatpush3.bf16.msra.mxu1 %v692_v7 }
  0x22   : > { %643 = vmatprep.subr.bf16.mxu0 %v693_v8  ;;  %669 = vmatprep.subr.bf16.mxu1 %v693_v8 }
  0x25   : > { %644 = vmatpush3.bf16.msra.mxu0 %v693_v8  ;;  %677 = vmatpush3.bf16.msra.mxu1 %v693_v8 }
  0x26   : > { %645 = vmatprep.subr.bf16.mxu0 %v694_v9  ;;  %670 = vmatprep.subr.bf16.mxu1 %v694_v9 }
  0x29   : > { %646 = vmatpush3.bf16.msra.mxu0 %v694_v9  ;;  %678 = vmatpush3.bf16.msra.mxu1 %v694_v9 }
  0x2c   : > { %648 = vmatmul.mubr.bf16.vlgmr.msra.gmra.mxu0 %v697_v10  ;;  %656 = vmatmul.mubr.bf16.vlgmr.msra.gmra.mxu1 %v698_v11 }
  0x2d   : > { %651 = vmatprep.mubr.bf16.mxu0 %v699_v12  ;;  %659 = vmatprep.mubr.bf16.mxu1 %v700_v13 }
  0x34   : > { %652 = vmatmul.mubr.bf16.gmra.mxu0 %v701_v14  ;;  %660 = vmatmul.mubr.bf16.gmra.mxu1 %v702_v15 }
  0xec   : > { %v649_v16 = vpop.f32.mrf.mxu0  ;;  %v657_v17 = vpop.f32.mrf.mxu1 }
  0xee   : > { %v310_v18 = vpop.f32.mrf.mxu0  ;;  %v342_v19 = vpop.f32.mrf.mxu1 }
  0xf0   : > { %v650_v20 = vpop.f32.mrf.mxu0  ;;  %v658_v21 = vpop.f32.mrf.mxu1 }
  0xf1   : > { %v576_v22 = vpack.c.bf16 %v650_v20, %v649_v16  ;;  %v596_v23 = vpack.c.bf16 %v658_v21, %v657_v17 }
  0xf2   : > { %v313_v24 = vpop.f32.mrf.mxu0  ;;  %v345_v25 = vpop.f32.mrf.mxu1 }
  0xf3   : > { %608 = vst [vmem:[%s145_s6 + $0x8] sm:$0xff] %v576_v22   ;;  %612 = vst [vmem:[%s145_s6 + $0x28] sm:$0xff] %v596_v23   ;;  %v571_v26 = vpack.c.bf16 %v313_v24, %v310_v18  ;;  %v591_v27 = vpack.c.bf16 %v345_v25, %v342_v19 }
  0xf4   : > { %v653_v28 = vpop.f32.mrf.mxu0  ;;  %v661_v29 = vpop.f32.mrf.mxu1 }
  0xf5   : > { %572 = vst [vmem:[%s145_s6] sm:$0xff] %v571_v26   ;;  %611 = vst [vmem:[%s145_s6 + $0x20] sm:$0xff] %v591_v27  }
  0xf6   : > { %v326_v30 = vpop.f32.mrf.mxu0  ;;  %v358_v31 = vpop.f32.mrf.mxu1 }
  0xf8   : > { %v654_v32 = vpop.f32.mrf.mxu0  ;;  %v662_v33 = vpop.f32.mrf.mxu1 }
  0xf9   : > { %v586_v34 = vpack.c.bf16 %v654_v32, %v653_v28  ;;  %v606_v35 = vpack.c.bf16 %v662_v33, %v661_v29 }
  0xfa   : > { %v329_v36 = vpop.f32.mrf.mxu0  ;;  %v361_v37 = vpop.f32.mrf.mxu1 }
  0xfb   : > { %610 = vst [vmem:[%s145_s6 + $0x18] sm:$0xff] %v586_v34   ;;  %614 = vst [vmem:[%s145_s6 + $0x38] sm:$0xff] %v606_v35   ;;  %v581_v38 = vpack.c.bf16 %v329_v36, %v326_v30  ;;  %v601_v39 = vpack.c.bf16 %v361_v37, %v358_v31 }
  0xfd   : > { %609 = vst [vmem:[%s145_s6 + $0x10] sm:$0xff] %v581_v38   ;;  %613 = vst [vmem:[%s145_s6 + $0x30] sm:$0xff] %v601_v39  }
  0xfe PF: > { %s12_s9 = sadd.s32 1, %s709_s9  }
  0xff   : > { %p9_p4 = scmp.ge.s32.totalorder %s12_s9, 4  }
 0x101   :  { %11 = sbr.rel (!%p9_p4) target bundleno = 1 (0x1), region = 58 }

// kernel: discriminator_forward.4
= control target key start
LH: loop header
LB: loop body
LE: loop exit
PB: predicated region body
PF: predicated region fallthrough
CT: control target
= control target key end

     0   :  { %s1188_s15 = smov 0   ;;  %s1320_s0 = inlined_call_operand.vmem [shape: bf16[256,256], index: 0, kind: input, shape index: {}]   ;;  %s1321_s1 = inlined_call_operand.vmem [shape: bf16[256,128], index: 1, kind: input, shape index: {}]   ;;  %s1322_s2 = inlined_call_operand.vmem [shape: f32[1,128], index: 2, kind: input, shape index: {}]   ;;  %s1323_s3 = inlined_call_operand.vmem [shape: bf16[128,128], index: 3, kind: input, shape index: {}]   ;;  %s1324_s4 = inlined_call_operand.vmem [shape: bf16[256,128], index: 4, kind: output, shape index: {}]  }
   0x1 LB: > { %s854_s16 = sadd.s32 4294967295, %s1161_s15   ;;  %p858_p0 = scmp.ge.s32.totalorder %s1161_s15, 1  ;;  %s1161_s15 = sphi %s1188_s15, %s14_s15  }
   0x2   : > { %p164_p1 = scmp.lt.s32.totalorder %s1161_s15, 3 }
   0x4   : > { %p165_p2 = pnand %p858_p0, %p164_p1 }
   0x5   : > { %s859_s19 = sshll.u32 (!%p165_p2), %s854_s16, 4 }
   0x6   : > { %168 = sbr.rel (%p165_p2) target bundleno = 509 (0x1fd), region = 36  ;;  %p192_p3 = scmp.lt.s32.totalorder (!%p165_p2), %s859_s19, 31 }
   0xb   : > { %v1107_v0 = vld [vmem:[%s1321_s1 + $0x78] sm:$0xff]   ;;  %v1109_v2 = vld [vmem:[%s1321_s1 + $0x70] sm:$0xff]   ;;  %v1111_v4 = vld [vmem:[%s1321_s1 + $0x68] sm:$0xff]   ;;  %s1326_s19 = smov (!%p192_p3, %s859_s19), 31 }
   0xc   : > { %v1108_v1 = vld [vmem:[%s1321_s1 + $0x38] sm:$0xff]   ;;  %987 = vmatprep.subr.bf16.mxu0 %v1107_v0  ;;  %v1110_v3 = vld [vmem:[%s1321_s1 + $0x30] sm:$0xff]   ;;  %v1112_v5 = vld [vmem:[%s1321_s1 + $0x28] sm:$0xff]   ;;  %s923_s8 = sshll.u32 %s1326_s19, 3  ;;  %s863_s24 = sshll.u32 %s1326_s19, 2 }
   0xd   : > { %988 = vmatpush3.bf16.msra.mxu0 %v1108_v1  ;;  %v1113_v6 = vld [vmem:[%s1321_s1 + $0x60] sm:$0xff]   ;;  %v1115_v8 = vld [vmem:[%s1321_s1 + $0x58] sm:$0xff]   ;;  %s1229_s13 = scalar_lea.vmem %s1320_s0, %s923_s8  ;;  %v1117_v10 = vld [vmem:[%s1321_s1 + $0x50] sm:$0xff]   ;;  %s202_s27 = scalar_lea.vmem %s1324_s4, %s863_s24 }
   0xe   : > { %989 = vmatprep.subr.bf16.mxu0 %v1109_v2  ;;  %v1114_v7 = vld [vmem:[%s1321_s1 + $0x20] sm:$0xff]   ;;  %v1116_v9 = vld [vmem:[%s1321_s1 + $0x18] sm:$0xff]   ;;  %v1118_v12 = vld [vmem:[%s1321_s1 + $0x10] sm:$0xff]  }
   0xf   : > { %v1125_v11 = vld [vmem:[%s1229_s13 + $0x4] ss:$8 sps:$4 sm:$0xff]   ;;  %v1147_v17 = vld [vmem:[%s1323_s3 + $0x38] sm:$0xff]   ;;  %v1123_v18 = vld [vmem:[%s1229_s13] ss:$8 sps:$4 sm:$0xff]  }
  0x10   : > { %468 = vmatprep.mubr.bf16.mxu0 %v1125_v11  ;;  %v1119_v13 = vld [vmem:[%s1321_s1 + $0x48] sm:$0xff]   ;;  %v1121_v15 = vld [vmem:[%s1321_s1 + $0x40] sm:$0xff]   ;;  %v1148_v19 = vld [vmem:[%s1323_s3 + $0x30] sm:$0xff]   ;;  %1067 = vmatprep.subr.bf16.mxu1 %v1147_v17 }
  0x11   : > { %990 = vmatpush3.bf16.msra.mxu0 %v1110_v3  ;;  %v1120_v14 = vld [vmem:[%s1321_s1 + $0x8] sm:$0xff]   ;;  %v1122_v16 = vld [vmem:[%s1321_s1] sm:$0xff]   ;;  %v1126_v20 = vld [vmem:[%s1229_s13 + $0x14] ss:$8 sps:$4 sm:$0xff]   ;;  %1068 = vmatpush3.bf16.msra.mxu1 %v1147_v17 }
  0x12   : > { %991 = vmatprep.subr.bf16.mxu0 %v1111_v4  ;;  %v1149_v21 = vld [vmem:[%s1323_s3 + $0x28] sm:$0xff]   ;;  %1069 = vmatprep.subr.bf16.mxu1 %v1148_v19  ;;  %v1128_v22 = vld [vmem:[%s1229_s13 + $0x10] ss:$8 sps:$4 sm:$0xff]   ;;  %v1132_v25 = vld [vmem:[%s1229_s13 + $0x34] ss:$8 sps:$4 sm:$0xff]  }
  0x13   : > { %v1129_v23 = vld [vmem:[%s1229_s13 + $0x24] ss:$8 sps:$4 sm:$0xff]   ;;  %v1131_v24 = vld [vmem:[%s1229_s13 + $0x20] ss:$8 sps:$4 sm:$0xff]   ;;  %v1134_v26 = vld [vmem:[%s1229_s13 + $0x30] ss:$8 sps:$4 sm:$0xff]  }
  0x14   : > { %v1135_v27 = vld [vmem:[%s1229_s13 + $0x44] ss:$8 sps:$4 sm:$0xff]   ;;  %v1137_v28 = vld [vmem:[%s1229_s13 + $0x40] ss:$8 sps:$4 sm:$0xff]   ;;  %v1138_v29 = vld [vmem:[%s1229_s13 + $0x54] ss:$8 sps:$4 sm:$0xff]  }
  0x15   : > { %992 = vmatpush3.bf16.msra.mxu0 %v1112_v5  ;;  %1070 = vmatpush3.bf16.msra.mxu1 %v1148_v19  ;;  %v1140_v30 = vld [vmem:[%s1229_s13 + $0x50] ss:$8 sps:$4 sm:$0xff]   ;;  %v1141_v31 = vld [vmem:[%s1229_s13 + $0x64] ss:$8 sps:$4 sm:$0xff]   ;;  %v1143_v32 = vld [vmem:[%s1229_s13 + $0x60] ss:$8 sps:$4 sm:$0xff]  }
  0x16   : > { %993 = vmatprep.subr.bf16.mxu0 %v1113_v6  ;;  %1071 = vmatprep.subr.bf16.mxu1 %v1149_v21  ;;  %v1144_v33 = vld [vmem:[%s1229_s13 + $0x74] ss:$8 sps:$4 sm:$0xff]   ;;  %v1146_v34 = vld [vmem:[%s1229_s13 + $0x70] ss:$8 sps:$4 sm:$0xff]   ;;  %v1150_v35 = vld [vmem:[%s1323_s3 + $0x20] sm:$0xff]  }
  0x17   : > { %v1151_v36 = vld [vmem:[%s1323_s3 + $0x18] sm:$0xff]   ;;  %v1152_v37 = vld [vmem:[%s1323_s3 + $0x10] sm:$0xff]   ;;  %v1153_v38 = vld [vmem:[%s1323_s3 + $0x8] sm:$0xff]  }
  0x18   : > { %v1154_v39 = vld [vmem:[%s1323_s3] sm:$0xff]  }
  0x19   : > { %994 = vmatpush3.bf16.msra.mxu0 %v1114_v7  ;;  %1072 = vmatpush3.bf16.msra.mxu1 %v1149_v21  ;;  %v1295_v44 = vld [vmem:[%s1322_s2] ss:$0 sm:$0xff] }
  0x1a   : > { %995 = vmatprep.subr.bf16.mxu0 %v1115_v8  ;;  %1073 = vmatprep.subr.bf16.mxu1 %v1150_v35 }
  0x1d   : > { %996 = vmatpush3.bf16.msra.mxu0 %v1116_v9  ;;  %1074 = vmatpush3.bf16.msra.mxu1 %v1150_v35 }
  0x1e   : > { %997 = vmatprep.subr.bf16.mxu0 %v1117_v10  ;;  %1075 = vmatprep.subr.bf16.mxu1 %v1151_v36 }
  0x21   : > { %998 = vmatpush3.bf16.msra.mxu0 %v1118_v12  ;;  %1076 = vmatpush3.bf16.msra.mxu1 %v1151_v36 }
  0x22   : > { %999 = vmatprep.subr.bf16.mxu0 %v1119_v13  ;;  %1077 = vmatprep.subr.bf16.mxu1 %v1152_v37 }
  0x25   : > { %1000 = vmatpush3.bf16.msra.mxu0 %v1120_v14  ;;  %1078 = vmatpush3.bf16.msra.mxu1 %v1152_v37 }
  0x26   : > { %1001 = vmatprep.subr.bf16.mxu0 %v1121_v15  ;;  %1079 = vmatprep.subr.bf16.mxu1 %v1153_v38 }
  0x29   : > { %1002 = vmatpush3.bf16.msra.mxu0 %v1122_v16  ;;  %1080 = vmatpush3.bf16.msra.mxu1 %v1153_v38 }
  0x2a   : > { %1081 = vmatprep.subr.bf16.mxu1 %v1154_v39 }
  0x2c   : > { %469 = vmatmul.mubr.bf16.vlgmr.msra.gmra.mxu0 %v1123_v18 }
  0x2d   : > { %476 = vmatprep.mubr.bf16.mxu0 %v1126_v20  ;;  %1082 = vmatpush3.bf16.msra.mxu1 %v1154_v39 }
  0x34   : > { %477 = vmatmul.mubr.bf16.gmra.mxu0 %v1128_v22 }
  0x35   : > { %484 = vmatprep.mubr.bf16.mxu0 %v1129_v23 }
  0x3c   : > { %485 = vmatmul.mubr.bf16.gmra.mxu0 %v1131_v24 }
  0x3d   : > { %492 = vmatprep.mubr.bf16.mxu0 %v1132_v25 }
  0x44   : > { %493 = vmatmul.mubr.bf16.gmra.mxu0 %v1134_v26 }
  0x45   : > { %500 = vmatprep.mubr.bf16.mxu0 %v1135_v27 }
  0x4c   : > { %501 = vmatmul.mubr.bf16.gmra.mxu0 %v1137_v28 }
  0x4d   : > { %508 = vmatprep.mubr.bf16.mxu0 %v1138_v29 }
  0x54   : > { %509 = vmatmul.mubr.bf16.gmra.mxu0 %v1140_v30 }
  0x55   : > { %516 = vmatprep.mubr.bf16.mxu0 %v1141_v31 }
  0x5c   : > { %517 = vmatmul.mubr.bf16.gmra.mxu0 %v1143_v32 }
  0x5d   : > { %524 = vmatprep.mubr.bf16.mxu0 %v1144_v33 }
  0x64   : > { %525 = vmatmul.mubr.bf16.gmra.mxu0 %v1146_v34 }
  0xec   : > { %v1003_v40 = vpop.f32.mrf.mxu0 }
  0xee   : > { %v1004_v41 = vpop.f32.mrf.mxu0 }
  0xef   : > { %v1005_v42 = vadd.f32 %v1004_v41, %v1003_v40 }
  0xf0   : > { %v1006_v43 = vpop.f32.mrf.mxu0 }
  0xf1   : > { %v471_v47 = vadd.f32 %v1005_v42, %v1295_v44 }
  0xf2   : > { %v1007_v45 = vpop.f32.mrf.mxu0 }
  0xf3   : > { %v1008_v46 = vadd.f32 %v1007_v45, %v1006_v43  ;;  %v533_v52 = vmax.f32 %v471_v47, 0.0 }
  0xf4   : > { %v1009_v48 = vpop.f32.mrf.mxu0 }
  0xf5   : > { %v474_v49 = vadd.f32 %v1008_v46, %v1295_v44 }
  0xf6   : > { %v1010_v50 = vpop.f32.mrf.mxu0 }
  0xf7   : > { %v1011_v51 = vadd.f32 %v1010_v50, %v1009_v48  ;;  %v534_v53 = vmax.f32 %v474_v49, 0.0 }
  0xf8   : > { %v1012_v54 = vpop.f32.mrf.mxu0 }
  0xf9   : > { %v549_v55 = vpack.c.bf16 %v534_v53, %v533_v52  ;;  %v479_v57 = vadd.f32 %v1011_v51, %v1295_v44 }
  0xfa   : > { %v1013_v56 = vpop.f32.mrf.mxu0 }
  0xfb   : > { %v1014_v58 = vadd.f32 %v1013_v56, %v1012_v54  ;;  %1083 = vmatprep.mubr.bf16.mxu1 %v549_v55  ;;  %v535_v62 = vmax.f32 %v479_v57, 0.0 }
  0xfc   : > { %v1015_v59 = vpop.f32.mrf.mxu0 }
  0xfd   : > { %v482_v60 = vadd.f32 %v1014_v58, %v1295_v44 }
  0xfe   : > { %v1016_v61 = vpop.f32.mrf.mxu0 }
  0xff   : > { %v536_v63 = vmax.f32 %v482_v60, 0.0  ;;  %v1017_v0 = vadd.f32 %v1016_v61, %v1015_v59 }
 0x100   : > { %v1018_v1 = vpop.f32.mrf.mxu0 }
 0x101   : > { %v550_v2 = vpack.c.bf16 %v536_v63, %v535_v62  ;;  %v487_v4 = vadd.f32 %v1017_v0, %v1295_v44 }
 0x102   : > { %v1019_v3 = vpop.f32.mrf.mxu0 }
 0x103   : > { %v1020_v5 = vadd.f32 %v1019_v3, %v1018_v1  ;;  %1084 = vmatmul.mubr.bf16.vlgmr.msra.gmra.mxu1 %v550_v2  ;;  %v537_v9 = vmax.f32 %v487_v4, 0.0 }
 0x104   : > { %v1021_v6 = vpop.f32.mrf.mxu0 }
 0x105   : > { %v490_v7 = vadd.f32 %v1020_v5, %v1295_v44 }
 0x106   : > { %v1022_v8 = vpop.f32.mrf.mxu0 }
 0x107   : > { %v538_v10 = vmax.f32 %v490_v7, 0.0  ;;  %v1023_v11 = vadd.f32 %v1022_v8, %v1021_v6 }
 0x108   : > { %v1024_v12 = vpop.f32.mrf.mxu0 }
 0x109   : > { %v551_v13 = vpack.c.bf16 %v538_v10, %v537_v9  ;;  %v495_v15 = vadd.f32 %v1023_v11, %v1295_v44 }
 0x10a   : > { %v1025_v14 = vpop.f32.mrf.mxu0 }
 0x10b   : > { %v1026_v16 = vadd.f32 %v1025_v14, %v1024_v12  ;;  %1087 = vmatprep.mubr.bf16.mxu1 %v551_v13  ;;  %v539_v20 = vmax.f32 %v495_v15, 0.0 }
 0x10c   : > { %v1027_v17 = vpop.f32.mrf.mxu0 }
 0x10d   : > { %v498_v18 = vadd.f32 %v1026_v16, %v1295_v44 }
 0x10e   : > { %v1028_v19 = vpop.f32.mrf.mxu0 }
 0x10f   : > { %v540_v21 = vmax.f32 %v498_v18, 0.0  ;;  %v1029_v22 = vadd.f32 %v1028_v19, %v1027_v17 }
 0x110   : > { %v1030_v23 = vpop.f32.mrf.mxu0 }
 0x111   : > { %v552_v24 = vpack.c.bf16 %v540_v21, %v539_v20  ;;  %v503_v26 = vadd.f32 %v1029_v22, %v1295_v44 }
 0x112   : > { %v1031_v25 = vpop.f32.mrf.mxu0 }
 0x113   : > { %v1032_v27 = vadd.f32 %v1031_v25, %v1030_v23  ;;  %1088 = vmatmul.mubr.bf16.gmra.mxu1 %v552_v24  ;;  %v541_v31 = vmax.f32 %v503_v26, 0.0 }
 0x114   : > { %v1033_v28 = vpop.f32.mrf.mxu0 }
 0x115   : > { %v506_v29 = vadd.f32 %v1032_v27, %v1295_v44 }
 0x116   : > { %v1034_v30 = vpop.f32.mrf.mxu0 }
 0x117   : > { %v542_v32 = vmax.f32 %v506_v29, 0.0  ;;  %v1035_v33 = vadd.f32 %v1034_v30, %v1033_v28 }
 0x118   : > { %v1036_v34 = vpop.f32.mrf.mxu0 }
 0x119   : > { %v553_v35 = vpack.c.bf16 %v542_v32, %v541_v31  ;;  %v511_v37 = vadd.f32 %v1035_v33, %v1295_v44 }
 0x11a   : > { %v1037_v36 = vpop.f32.mrf.mxu0 }
 0x11b   : > { %v1038_v38 = vadd.f32 %v1037_v36, %v1036_v34  ;;  %1091 = vmatprep.mubr.bf16.mxu1 %v553_v35  ;;  %v543_v42 = vmax.f32 %v511_v37, 0.0 }
 0x11c   : > { %v1039_v39 = vpop.f32.mrf.mxu0 }
 0x11d   : > { %v514_v40 = vadd.f32 %v1038_v38, %v1295_v44 }
 0x11e   : > { %v1040_v41 = vpop.f32.mrf.mxu0 }
 0x11f   : > { %v544_v43 = vmax.f32 %v514_v40, 0.0  ;;  %v1041_v45 = vadd.f32 %v1040_v41, %v1039_v39 }
 0x120   : > { %v1042_v46 = vpop.f32.mrf.mxu0 }
 0x121   : > { %v554_v47 = vpack.c.bf16 %v544_v43, %v543_v42  ;;  %v519_v49 = vadd.f32 %v1041_v45, %v1295_v44 }
 0x122   : > { %v1043_v48 = vpop.f32.mrf.mxu0 }
 0x123   : > { %v1044_v50 = vadd.f32 %v1043_v48, %v1042_v46  ;;  %1092 = vmatmul.mubr.bf16.gmra.mxu1 %v554_v47  ;;  %v545_v54 = vmax.f32 %v519_v49, 0.0 }
 0x124   : > { %v1045_v51 = vpop.f32.mrf.mxu0 }
 0x125   : > { %v522_v52 = vadd.f32 %v1044_v50, %v1295_v44 }
 0x126   : > { %v1046_v53 = vpop.f32.mrf.mxu0 }
 0x127   : > { %v546_v55 = vmax.f32 %v522_v52, 0.0  ;;  %v1047_v56 = vadd.f32 %v1046_v53, %v1045_v51 }
 0x128   : > { %v1048_v57 = vpop.f32.mrf.mxu0 }
 0x129   : > { %v555_v58 = vpack.c.bf16 %v546_v55, %v545_v54  ;;  %v527_v60 = vadd.f32 %v1047_v56, %v1295_v44 }
 0x12a   : > { %v1049_v59 = vpop.f32.mrf.mxu0 }
 0x12b   : > { %v1050_v61 = vadd.f32 %v1049_v59, %v1048_v57  ;;  %1095 = vmatprep.mubr.bf16.mxu1 %v555_v58  ;;  %v547_v63 = vmax.f32 %v527_v60, 0.0 }
 0x12d   : > { %v530_v62 = vadd.f32 %v1050_v61, %v1295_v44 }
 0x12f   : > { %v548_v0 = vmax.f32 %v530_v62, 0.0 }
 0x131   : > { %v556_v1 = vpack.c.bf16 %v548_v0, %v547_v63 }
 0x133   : > { %1096 = vmatmul.mubr.bf16.gmra.mxu1 %v556_v1 }
 0x1c3   : > { %v1085_v2 = vpop.f32.mrf.mxu1 }
 0x1c5   : > { %v655_v3 = vpop.f32.mrf.mxu1 }
 0x1c7   : > { %v1086_v4 = vpop.f32.mrf.mxu1 }
 0x1c8   : > { %v948_v5 = vpack.c.bf16 %v1086_v4, %v1085_v2 }
 0x1c9   : > { %v658_v6 = vpop.f32.mrf.mxu1 }
 0x1ca   : > { %980 = vst [vmem:[%s202_s27 + $0x8] sm:$0xff] %v948_v5   ;;  %v943_v7 = vpack.c.bf16 %v658_v6, %v655_v3 }
 0x1cc   : > { %944 = vst [vmem:[%s202_s27] sm:$0xff] %v943_v7  }
 0x1d3   : > { %v1089_v8 = vpop.f32.mrf.mxu1 }
 0x1d5   : > { %v671_v9 = vpop.f32.mrf.mxu1 }
 0x1d7   : > { %v1090_v44 = vpop.f32.mrf.mxu1 }
 0x1d8   : > { %v958_v10 = vpack.c.bf16 %v1090_v44, %v1089_v8 }
 0x1d9   : > { %v674_v11 = vpop.f32.mrf.mxu1 }
 0x1da   : > { %982 = vst [vmem:[%s202_s27 + $0x18] sm:$0xff] %v958_v10   ;;  %v953_v12 = vpack.c.bf16 %v674_v11, %v671_v9 }
 0x1dc   : > { %981 = vst [vmem:[%s202_s27 + $0x10] sm:$0xff] %v953_v12  }
 0x1e3   : > { %v1093_v13 = vpop.f32.mrf.mxu1 }
 0x1e5   : > { %v687_v14 = vpop.f32.mrf.mxu1 }
 0x1e7   : > { %v1094_v15 = vpop.f32.mrf.mxu1 }
 0x1e8   : > { %v968_v16 = vpack.c.bf16 %v1094_v15, %v1093_v13 }
 0x1e9   : > { %v690_v17 = vpop.f32.mrf.mxu1 }
 0x1ea   : > { %984 = vst [vmem:[%s202_s27 + $0x28] sm:$0xff] %v968_v16   ;;  %v963_v18 = vpack.c.bf16 %v690_v17, %v687_v14 }
 0x1ec   : > { %983 = vst [vmem:[%s202_s27 + $0x20] sm:$0xff] %v963_v18  }
 0x1f3   : > { %v1097_v19 = vpop.f32.mrf.mxu1 }
 0x1f5   : > { %v703_v20 = vpop.f32.mrf.mxu1 }
 0x1f7   : > { %v1098_v21 = vpop.f32.mrf.mxu1 }
 0x1f8   : > { %v978_v22 = vpack.c.bf16 %v1098_v21, %v1097_v19 }
 0x1f9   : > { %v706_v23 = vpop.f32.mrf.mxu1 }
 0x1fa   : > { %986 = vst [vmem:[%s202_s27 + $0x38] sm:$0xff] %v978_v22   ;;  %v973_v24 = vpack.c.bf16 %v706_v23, %v703_v20 }
 0x1fc   : > { %985 = vst [vmem:[%s202_s27 + $0x30] sm:$0xff] %v973_v24  }
 0x1fd PF: > { %s14_s15 = sadd.s32 1, %s1161_s15  }
 0x1fe   : > { %p11_p4 = scmp.ge.s32.totalorder %s14_s15, 4  }
 0x200   :  { %13 = sbr.rel (!%p11_p4) target bundleno = 1 (0x1), region = 66 }

</bundles_post_ra>
